<compile_context>
chip_gen: v5e
topology: v5e:2x2
jax: 0.10.0
libtpu: 0.0.40
codegen_flags: <defaults>
</compile_context>

<pallas_src>
import jax
import jax.numpy as jnp
from jax import lax
from jax.experimental import pallas as pl
from jax.experimental.pallas import tpu as pltpu


_LANE = 128            # TPU lane width (last-dim tiling granularity)
_CHUNK = 1024          # pixels per inner compute step (8 f32 output vregs)
_DEFAULT_TM = 131072   # pixels per DMA block (~6 MiB HBM traffic per block)


# ----------------------------- Pallas kernel ------------------------------ #

def _conv_chunk(x_ref, w, bias, o_ref, start, ch):
    """out[:, start:start+ch] = bias + W @ x[:, start:start+ch] via VPU FMAs."""
    cin = x_ref.shape[1]
    xs = x_ref[0, :, pl.ds(start, ch)]                 # (Cin, ch)
    acc = bias                                         # (Cout, ch), bias pre-bcast
    for k in range(cin):                               # static: Cin = 4**count_flod
        # (1, ch) sublane-bcast  x  (Cout, 1) lane-bcast  ->  (Cout, ch)
        acc = acc + xs[k:k + 1, :] * w[:, k:k + 1]
    o_ref[0, :, pl.ds(start, ch)] = acc.astype(o_ref.dtype)


def _focus_conv1x1_kernel(x_ref, w_ref, b_ref, o_ref):
    """One (batch, pixel-tile) block of the 1x1 conv.

    x_ref: (1, Cin,  TM)  folded activations, pixels on the lane axis
    w_ref: (Cout, Cin)    resident in VMEM across the whole grid
    b_ref: (Cout, 1)      resident
    o_ref: (1, Cout, TM)  lane-dense output block (already NCHW layout)

    The contraction is tiny (Cin = 4**k, Cout = out_channels) so it is done
    as Cin broadcast-FMAs on the VPU instead of the MXU: exact f32, and it
    hides under the block's HBM DMA on every generation.
    """
    cout = o_ref.shape[1]
    tm = o_ref.shape[2]
    # Chunk the pixel axis so intermediates stay a few vregs.
    ch = _CHUNK if (tm % _CHUNK == 0 and tm > _CHUNK) else tm
    n_chunks = tm // ch

    w = w_ref[...]                                         # (Cout, Cin), tiny
    bias = jnp.broadcast_to(b_ref[...], (cout, ch))        # hoisted lane bcast

    if n_chunks == 1:
        _conv_chunk(x_ref, w, bias, o_ref, 0, ch)
    else:
        def body(j, carry):
            _conv_chunk(x_ref, w, bias, o_ref,
                        pl.multiple_of(j * ch, ch), ch)
            return carry
        lax.fori_loop(0, n_chunks, body, 0)


def _pick_pixel_tile(P, N, tm_user):
    """Lane-aligned pixel tile; never pads, keeps >=2 blocks/batch on large P."""
    tm = _DEFAULT_TM if tm_user is None else tm_user
    if P <= _LANE or (P <= _CHUNK and tm >= P):
        return P                                    # single full-extent block
    tm = max(_LANE, (min(tm, P) // _LANE) * _LANE)
    if tm_user is None:
        # >= 2 pixel blocks per batch element (pipelining overlap + megacore
        # work on v7x), ideally N * grid_m >= 4.
        want = 2 if N >= 2 else 4
        cap = max(_LANE, (pl.cdiv(P, want) // _LANE) * _LANE)
        tm = min(tm, cap)
    return tm


def focus_conv1x1(xf, w, b, *, tm=None):
    """1x1 conv on NCHW-flattened activations.

    xf: (N, Cin, P) with P = Hout * Wout   (free reshape of NCHW)
    w:  (Cout, Cin)
    b:  (Cout,)
    returns (N, Cout, P)
    """
    N, Cin, P = xf.shape
    Cout = w.shape[0]
    tile = _pick_pixel_tile(P, N, tm)
    grid_m = pl.cdiv(P, tile)   # partial last block: OOB writes are dropped

    return pl.pallas_call(
        _focus_conv1x1_kernel,
        out_shape=jax.ShapeDtypeStruct((N, Cout, P), xf.dtype),
        grid_spec=pltpu.PrefetchScalarGridSpec(
            num_scalar_prefetch=0,
            grid=(N, grid_m),
            in_specs=[
                pl.BlockSpec((1, Cin, tile), lambda n, m: (n, 0, m)),
                pl.BlockSpec((Cout, Cin), lambda n, m: (0, 0)),
                pl.BlockSpec((Cout, 1), lambda n, m: (0, 0)),
            ],
            out_specs=pl.BlockSpec((1, Cout, tile), lambda n, m: (n, 0, m)),
        ),
        compiler_params=pltpu.CompilerParams(
            # Both axes are independent -> shard across TensorCores (v7x).
            dimension_semantics=("parallel", "parallel"),
            # x blocks are sublane-padded Cin=4->8, so at the default tile the
            # live footprint is ~2*(4+4) MiB double-buffered (+ tiny W/b).
            # 40 MiB leaves headroom and stays under v7x's 64 MiB physical.
            vmem_limit_bytes=40 * 1024 * 1024,
        ),
    )(xf, w, b.reshape(Cout, 1))


# ------------------------------ Focus module ------------------------------ #

class FocusPallas:
    """JAX/Pallas port of `Focus` (space-to-depth fold + 1x1 conv)."""

    def __init__(self, out_channels, downrate=2, kernel_size=1, padding=0,
                 key=jax.random.PRNGKey(42)):
        self.count_flod = 0
        while downrate % 2 == 0:
            self.count_flod += 1
            downrate //= 2
        in_ch = 4 ** self.count_flod

        # TODO(synk): only the module's default kernel_size=1 / padding=0 path
        # is implemented (a general KxK conv would need an im2col kernel).
        assert kernel_size == 1 and padding == 0

        # Deterministic Kaiming-uniform-like init (nn.Conv2d shapes:
        # weight (Cout, Cin, 1, 1) squeezed to (Cout, Cin), bias (Cout,)).
        kw, kb = jax.random.split(key)
        fan_in = in_ch * kernel_size * kernel_size
        bound = 1.0 / (fan_in ** 0.5)
        self.weight = jax.random.uniform(kw, (out_channels, in_ch),
                                         jnp.float32, -bound, bound)
        self.bias = jax.random.uniform(kb, (out_channels,),
                                       jnp.float32, -bound, bound)
        self.out_channels = out_channels

    def fold(self, x):
        # Space-to-depth fold: one fused XLA pass per fold level.
        # TODO(synk): collapse to a single pass for count_flod > 1 and fuse it
        # into the conv kernel (2x2/stride-2 conv) to drop an HBM roundtrip.
        for _ in range(self.count_flod):
            tl = x[..., ::2, ::2]
            tr = x[..., ::2, 1::2]
            bl = x[..., 1::2, ::2]
            br = x[..., 1::2, 1::2]
            x = jnp.concatenate((tl, bl, tr, br), axis=1)
        return x

    def __call__(self, x, *, tm=None):
        # x: (N, C, H, W) NCHW, same as the PyTorch module.
        x = self.fold(x)
        N, Cin, Ho, Wo = x.shape
        # NCHW -> (N, Cin, Hout*Wout): contiguous reshape, NO transpose.
        xf = x.reshape(N, Cin, Ho * Wo)
        y = focus_conv1x1(xf, self.weight, self.bias, tm=tm)
        # (N, Cout, P) -> NCHW: contiguous reshape, NO transpose.
        return y.reshape(N, self.out_channels, Ho, Wo)


# ------------------------------- reference --------------------------------- #

def _reference_forward(module: FocusPallas, x):
    """Pure-JAX reference (exact f32 contraction, no MXU truncation)."""
    x = module.fold(x)
    y = (x[:, None, :, :, :]
         * module.weight[None, :, :, None, None]).sum(axis=2)
    return y + module.bias.reshape(1, -1, 1, 1)


# --------------------------------- main ------------------------------------ #

if __name__ == "__main__":
    root = jax.random.PRNGKey(0)
    k_mod, k1, k2, k3, k4 = jax.random.split(root, 5)

    out_channels = 8
    focus = FocusPallas(out_channels=out_channels, downrate=2,
                        kernel_size=1, padding=0, key=k_mod)

    def check(x, tm=None):
        y = jax.block_until_ready(focus(x, tm=tm))
        r = _reference_forward(focus, x)
        assert y.shape == r.shape, (y.shape, r.shape)
        err = float(jnp.max(jnp.abs(y - r)))
        assert jnp.allclose(y, r, atol=1e-5, rtol=1e-5), err
        return y

    # Case 1: tiny shape -> single full-extent pixel block per batch element.
    # Focus with downrate=2 folds once, so the conv expects 4**1 = 4 input
    # channels, i.e. a single-channel input image.
    x1 = jax.random.normal(k1, (2, 1, 16, 16), dtype=jnp.float32)
    y1 = check(x1)
    assert y1.shape == (2, out_channels, 8, 8), y1.shape

    # Case 2: explicit small tile -> grid (2, 3) with a PARTIAL last block
    # (P = 576 = 2*256 + 64): verifies OOB block writes are dropped (no pad,
    # no trailing slice).
    x2 = jax.random.normal(k2, (2, 1, 48, 48), dtype=jnp.float32)
    check(x2, tm=256)

    # Case 3: default tile picker on P=1600, N=1 -> auto-splits into >=4
    # pixel blocks (tile 384) with a partial tail.
    x3 = jax.random.normal(k3, (1, 1, 80, 80), dtype=jnp.float32)
    check(x3)

    # Case 4: tile 2048 on P=2304 -> exercises the multi-chunk inner loop
    # (2 chunks of 1024 pixels) plus a partial last block.
    x4 = jax.random.normal(k4, (1, 1, 96, 96), dtype=jnp.float32)
    check(x4, tm=2048)

    print("KERNEL_OK")
</pallas_src>

<mosaic_0001>
module attributes {stable_mosaic.version = 11 : i64} {
  func.func @_focus_conv1x1_kernel(%arg0: i32, %arg1: i32, %arg2: memref<1x4x64xf32, #tpu.memory_space<vmem>>, %arg3: memref<8x4xf32, #tpu.memory_space<vmem>>, %arg4: memref<8x1xf32, #tpu.memory_space<vmem>>, %arg5: memref<1x8x64xf32, #tpu.memory_space<vmem>>) attributes {dimension_semantics = [#tpu.dimension_semantics<parallel>, #tpu.dimension_semantics<parallel>], iteration_bounds = array<i64: 2, 1>, scalar_prefetch = 0 : i64, scratch_operands = 0 : i64, tpu.core_type = #tpu.core_type<tc>, window_params = [{transform_indices = @transform_0, window_bounds = array<i64: 1, 4, 64>}, {pipeline_mode = #tpu.pipeline_mode<synchronous>, transform_indices = @transform_1, window_bounds = array<i64: 8, 4>}, {pipeline_mode = #tpu.pipeline_mode<synchronous>, transform_indices = @transform_2, window_bounds = array<i64: 8, 1>}, {transform_indices = @transform_3, window_bounds = array<i64: 1, 8, 64>}]} {
    %c0 = arith.constant 0 : index
    %c0_0 = arith.constant 0 : index
    %0 = vector.load %arg3[%c0, %c0_0] : memref<8x4xf32, #tpu.memory_space<vmem>>, vector<8x4xf32>
    %c0_1 = arith.constant 0 : index
    %c0_2 = arith.constant 0 : index
    %1 = vector.load %arg4[%c0_1, %c0_2] : memref<8x1xf32, #tpu.memory_space<vmem>>, vector<8x1xf32>
    %2 = vector.shape_cast %1 : vector<8x1xf32> to vector<8x1xf32>
    %3 = vector.broadcast %2 : vector<8x1xf32> to vector<8x64xf32>
    %c0_3 = arith.constant 0 : index
    %c0_4 = arith.constant 0 : index
    %c0_5 = arith.constant 0 : index
    %4 = vector.load %arg2[%c0_3, %c0_4, %c0_5] : memref<1x4x64xf32, #tpu.memory_space<vmem>>, vector<1x4x64xf32>
    %5 = vector.shape_cast %4 : vector<1x4x64xf32> to vector<4x64xf32>
    %6 = vector.extract_strided_slice %5 {offsets = [0, 0], sizes = [1, 64], strides = [1, 1]} : vector<4x64xf32> to vector<1x64xf32>
    %7 = vector.extract_strided_slice %0 {offsets = [0, 0], sizes = [8, 1], strides = [1, 1]} : vector<8x4xf32> to vector<8x1xf32>
    %8 = vector.broadcast %6 : vector<1x64xf32> to vector<8x64xf32>
    %9 = vector.broadcast %7 : vector<8x1xf32> to vector<8x64xf32>
    %10 = arith.mulf %8, %9 : vector<8x64xf32>
    %11 = arith.addf %3, %10 : vector<8x64xf32>
    %12 = vector.extract_strided_slice %5 {offsets = [1, 0], sizes = [1, 64], strides = [1, 1]} : vector<4x64xf32> to vector<1x64xf32>
    %13 = vector.extract_strided_slice %0 {offsets = [0, 1], sizes = [8, 1], strides = [1, 1]} : vector<8x4xf32> to vector<8x1xf32>
    %14 = vector.broadcast %12 : vector<1x64xf32> to vector<8x64xf32>
    %15 = vector.broadcast %13 : vector<8x1xf32> to vector<8x64xf32>
    %16 = arith.mulf %14, %15 : vector<8x64xf32>
    %17 = arith.addf %11, %16 : vector<8x64xf32>
    %18 = vector.extract_strided_slice %5 {offsets = [2, 0], sizes = [1, 64], strides = [1, 1]} : vector<4x64xf32> to vector<1x64xf32>
    %19 = vector.extract_strided_slice %0 {offsets = [0, 2], sizes = [8, 1], strides = [1, 1]} : vector<8x4xf32> to vector<8x1xf32>
    %20 = vector.broadcast %18 : vector<1x64xf32> to vector<8x64xf32>
    %21 = vector.broadcast %19 : vector<8x1xf32> to vector<8x64xf32>
    %22 = arith.mulf %20, %21 : vector<8x64xf32>
    %23 = arith.addf %17, %22 : vector<8x64xf32>
    %24 = vector.extract_strided_slice %5 {offsets = [3, 0], sizes = [1, 64], strides = [1, 1]} : vector<4x64xf32> to vector<1x64xf32>
    %25 = vector.extract_strided_slice %0 {offsets = [0, 3], sizes = [8, 1], strides = [1, 1]} : vector<8x4xf32> to vector<8x1xf32>
    %26 = vector.broadcast %24 : vector<1x64xf32> to vector<8x64xf32>
    %27 = vector.broadcast %25 : vector<8x1xf32> to vector<8x64xf32>
    %28 = arith.mulf %26, %27 : vector<8x64xf32>
    %29 = arith.addf %23, %28 : vector<8x64xf32>
    %c0_6 = arith.constant 0 : index
    %c0_7 = arith.constant 0 : index
    %c0_8 = arith.constant 0 : index
    %30 = vector.load %arg5[%c0_6, %c0_7, %c0_8] : memref<1x8x64xf32, #tpu.memory_space<vmem>>, vector<1x8x64xf32>
    %31 = vector.shape_cast %30 : vector<1x8x64xf32> to vector<8x64xf32>
    %32 = vector.shape_cast %29 : vector<8x64xf32> to vector<1x8x64xf32>
    tpu.vector_store %arg5[%c0_6, %c0_7, %c0_8], %32 {strides = array<i32>} : memref<1x8x64xf32, #tpu.memory_space<vmem>>, vector<1x8x64xf32>,
    return
  }
  func.func @transform_0(%arg0: i32, %arg1: i32) -> (i32, i32, i32) {
    %c0_i32 = arith.constant 0 : i32
    %c0_i32_0 = arith.constant 0 : i32
    return %arg0, %c0_i32, %arg1 : i32, i32, i32
  }
  func.func @transform_1(%arg0: i32, %arg1: i32) -> (i32, i32) {
    %c0_i32 = arith.constant 0 : i32
    %c0_i32_0 = arith.constant 0 : i32
    %c0_i32_1 = arith.constant 0 : i32
    return %c0_i32, %c0_i32_0 : i32, i32
  }
  func.func @transform_2(%arg0: i32, %arg1: i32) -> (i32, i32) {
    %c0_i32 = arith.constant 0 : i32
    %c0_i32_0 = arith.constant 0 : i32
    %c0_i32_1 = arith.constant 0 : i32
    return %c0_i32, %c0_i32_0 : i32, i32
  }
  func.func @transform_3(%arg0: i32, %arg1: i32) -> (i32, i32, i32) {
    %c0_i32 = arith.constant 0 : i32
    %c0_i32_0 = arith.constant 0 : i32
    return %arg0, %c0_i32, %arg1 : i32, i32, i32
  }
}

</mosaic_0001>

<bundles_post_ra>
// kernel: tpu_custom_call.1
= control target key start
LH: loop header
LB: loop body
LE: loop exit
PB: predicated region body
PF: predicated region fallthrough
CT: control target
= control target key end

     0   :  { %8 = vsyncpa [#allocation3], 0  ;;  %s600_s0 = inlined_call_operand.vmem [shape: f32[2,4,64], index: 0, kind: input, shape index: {}]   ;;  %s601_s1 = inlined_call_operand.vmem [shape: f32[8,4], index: 1, kind: input, shape index: {}]   ;;  %s602_s2 = inlined_call_operand.vmem [shape: f32[8,1], index: 2, kind: input, shape index: {}]   ;;  %s603_s3 = inlined_call_operand.hbm [shape: f32[2,8,64], index: 3, kind: output, shape index: {}]  }
   0x1   :  { %10 = vsyncpa [#allocation3 + $0x1], 0  ;;  %s497_s12 = smov 0   ;;  %s499_s13 = smov 0  }
   0x2   :  { %s501_s14 = smov 0   ;;  %s503_s15 = smov 0  }
   0x3   :  { %s505_s16 = smov 0   ;;  %s507_s17 = smov 0  }
   0x4 LB: > { %s318_s18 = sadd.s32 4294967295, %s471_s17   ;;  %s319_s19 = sadd.s32 4294967294, %s471_s17   ;;  %s471_s17 = sphi %s507_s17, %s16_s17   ;;  %s467_s16 = sphi %s505_s16, %s610_s16   ;;  %s463_s15 = sphi %s503_s15, %s609_s15   ;;  %s459_s14 = sphi %s501_s14, %s608_s14   ;;  %s455_s13 = sphi %s499_s13, %s607_s13   ;;  %s451_s12 = sphi %s497_s12, %s606_s12  }
   0x5   : > { %s28_s20 = sadd.s32 1, %s467_s16  ;;  %s107_s21 = sadd.s32 1, %s459_s14 }
   0x6   : > { %p30_p0 = scmp.ge.s32.totalorder %s28_s20, 2  ;;  %p117_p1 = scmp.ne.s32.totalorder %s459_s14, %s455_s13 }
   0x7   : > { %p118_p2 = scmp.eq.s32.totalorder %s318_s18, 1  ;;  %p123_p3 = scmp.ne.s32.totalorder %s455_s13, %s451_s12 }
   0x8   : > { %s612_s20 = smov (%p30_p0, %s28_s20), 0  ;;  %p124_p5 = scmp.eq.s32.totalorder %s319_s19, 1 }
   0x9   : > { %p537_p4 = por %p118_p2, %p117_p1  ;;  %s102_s23 = ssub.s32 %s467_s16, %s612_s20 }
   0xa   : > { %p322_p6 = scmp.ge.s32.totalorder %s471_s17, 1  ;;  %p105_p7 = scmp.eq.s32.totalorder %s102_s23, 0 }
   0xb   : > { %p544_p8 = por %p124_p5, %p123_p3  ;;  %p158_p9 = scmp.lt.s32.totalorder %s471_s17, 3 }
   0xc   : > { %s550_s25 = scalar_select %p105_p7, %s459_s14, %s107_s21  }
   0xd   : > { %p159_p10 = pnand %p322_p6, %p158_p9 }
   0xe   : > { %p184_p11 = scmp.lt.s32.totalorder (!%p159_p10), %s463_s15, 1  ;;  %s181_s8 = sand.u32 (!%p159_p10), 1, %s455_s13  }
   0xf   : > { %162 = sbr.rel (%p159_p10) target bundleno = 156 (0x9c), region = 32  ;;  %s323_s9 = sshll.u32 (!%p159_p10), %s181_s8, 3 }
  0x10   : > { %s326_s10 = sshll.u32 (!%p159_p10), %s463_s15, 3  ;;  %s183_s21 = scalar_lea.vmem (!%p159_p10), [#allocation2], %s323_s9 }
  0x11   : > { %s242_s19 = scalar_lea.hbm (!%p159_p10), %s603_s3, %s326_s10  ;;  %s244_s23 = sshll.u32 (!%p159_p10), %s183_s21, 4  ;;  %s245_s23 = int_to_ptr.vmem [resolvable:$true] %s244_s23 }
  0x12   : > { %s246_s26 = sshll.u32 (!%p159_p10), %s242_s19, 4  ;;  %s247_s26 = int_to_ptr.hbm [resolvable:$true] %s246_s26 }
  0x13   : > { %s407_s27 = sshra.s32 (!%p159_p10), %s247_s26, 4  ;;  %s408_s27 = int_to_ptr.hbm [resolvable:$true] %s407_s27 }
  0x14   : > { %v191_v0 = vld [vmem:[%s601_s1] sm:$0xff]  ;;  %v473_v1 = vmov 0   ;;  %v474_v2 = vmov 1   ;;  %v475_v3 = vmov 3   ;;  %v476_v5 = vmov 2   ;;  %s185_s30 = scalar_select %p184_p11, %s463_s15, 1 }
  0x15   : > { %388 = vset.pattern.permute.xlu0 %v473_v1  ;;  %389 = vset.pattern.permute.xlu1 %v474_v2  ;;  %v192_v4 = vld [vmem:[%s602_s2] sm:$0xff]  ;;  %vm228_vm0 = vcmask 523264   ;;  %s231_s15 = scalar_lea.sflag [#allocation3], %s181_s8  ;;  %s409_s28 = scalar_lea.hbm %s408_s27, 8 }
  0x16   : > { %202 = vperm.xlu0 %388, %v191_v0   ;;  %209 = vperm.xlu1 %389, %v191_v0   ;;  %s324_s4 = sshll.u32 %s185_s30, 2  ;;  %p410_p12 = scmp.ne.s32.totalorder %s408_s27, %s409_s28 }
  0x17   : > { %391 = vset.pattern.permute.xlu2 %v475_v3  ;;  %s190_s7 = scalar_lea.vmem %s600_s0, %s324_s4  ;;  %s413_s4 = scalar_lea.hbm %s603_s3, 16 }
  0x18   : > { %223 = vperm.xlu2 %391, %v191_v0   ;;  %v198_v7 = vld [vmem:[%s190_s7] sm:$0xf]  ;;  %p411_p13 = pnand %p410_p12, %p537_p4  ;;  %p414_p1 = scmp.lt.s32.totalorder %s408_s27, %s603_s3 }
  0x19   : > { %v199_v9 = vperm.slane %v198_v7, 0  ;;  %v207_v10 = vperm.slane %v198_v7, 1  ;;  %v214_v11 = vperm.slane %v198_v7, 2  ;;  %v221_v13 = vperm.slane %v198_v7, 3  ;;  %p415_p2 = scmp.lt.s32.totalorder %s413_s4, %s409_s28 }
  0x1a   : > { %p412_p0 = pneg %p411_p13 }
  0x1b   : > { %p416_p3 = por %p415_p2, %p414_p1 }
  0x1d   : > { %p417_p5 = pnand %p416_p3, %p412_p0 }
  0x1e   : > { %195 = vperm.xlu0 %388, %v192_v4   ;;  %390 = vset.pattern.permute.xlu1 %v476_v5 }
  0x1f   : > { %216 = vperm.xlu1 %390, %v191_v0  }
  0x26   : > { %392 = vset.pattern.permute.xlu0 %v475_v3 }
  0x72   : > { %v224_v15 = vpop.permute.xlu2 %223 }
  0x73   : > { %v226_v21 = vmul.f32 %v224_v15, %v221_v13 }
  0x88   : > { %v203_v6 = vpop.permute.xlu0 %202  ;;  %v210_v8 = vpop.permute.xlu1 %209 }
  0x89   : > { %v205_v12 = vmul.f32 %v203_v6, %v199_v9  ;;  %v212_v16 = vmul.f32 %v210_v8, %v207_v10 }
  0x90   : > { %v196_v14 = vpop.permute.xlu0 %195 }
  0x91   : > { %v206_v17 = vadd.f32 %v205_v12, %v196_v14  ;;  %v217_v18 = vpop.permute.xlu1 %216 }
  0x92   : > { %v219_v19 = vmul.f32 %v217_v18, %v214_v11 }
  0x93   : > { %v213_v20 = vadd.f32 %v212_v16, %v206_v17 }
  0x95   : > { %v220_v22 = vadd.f32 %v219_v19, %v213_v20 }
  0x97   : > { %v227_v23 = vadd.f32 %v226_v21, %v220_v22 }
  0x99   : > { %229 = vst.msk [vmem:[%s183_s21] sm:$0xff] %vm228_vm0, %v227_v23 }
  0x9a   : > { %420 = shalt.err (!%p417_p5)
}
  0x9b   : > { %329 = dma.vmem_to_hbm [thread:$0]  (%p537_p4), %s245_s23, 128, %s247_s26, %s231_s15  }
  0x9c PF: > { %p335_p6 = scmp.ge.s32.totalorder %s471_s17, 2  ;;  %s258_s7 = sand.u32 1, %s451_s12  }
  0x9d   : > { %s259_s8 = scalar_lea.sflag [#allocation3], %s258_s7 }
  0x9e   : > { %p332_p7 = pnand %p335_p6, %p544_p8 }
  0xa0   : > { %p333_p9 = pneg %p332_p7 }
  0xa2   : > { %446 = dma.done.wait (%p333_p9), %s259_s8, 128  }
  0xa3   : > { %448 = vsyncadd (%p333_p9), %s259_s8, 4294967168  ;;  %s16_s17 = sadd.s32 1, %s471_s17   ;;  %s606_s12 = smov %s455_s13 }
  0xa4   : > { %p13_p10 = scmp.ge.s32.totalorder %s16_s17, 4   ;;  %s607_s13 = smov %s459_s14 }
  0xa5   : > { %s608_s14 = smov %s550_s25  ;;  %s609_s15 = smov %s467_s16 }
  0xa6   : > { %s610_s16 = smov %s612_s20  ;;  %15 = sbr.rel (!%p13_p10) target bundleno = 4 (0x4), region = 67 }
  0xab   :  { %265 = vsyncpa [#allocation3], 1 }
  0xac   :  { %267 = vsyncpa [#allocation3 + $0x1], 1 }

</bundles_post_ra>
